<compile_context>
chip_gen: v5e
topology: v5e:2x2
jax: 0.10.0
libtpu: 0.0.40
codegen_flags: <defaults>
</compile_context>

<pallas_src>
import functools

import jax
import jax.numpy as jnp
from jax import lax
from jax.experimental import pallas as pl
from jax.experimental.pallas import tpu as pltpu


def _kl_sum_kernel(p_ref, t_ref, o_ref, acc_ref, *,
                   num_cols, lane_tile, s_inner, num_full_tiles, needs_mask):
    """Grid step (b, so, si): a (nb, c, TL) tile; channel softmax on axis=1."""
    si = pl.program_id(2)

    @pl.when(si == 0)
    def _():
        acc_ref[...] = jnp.zeros_like(acc_ref)

    p = p_ref[...].astype(jnp.float32)     # (nb, c, TL) preds tile
    t = t_ref[...].astype(jnp.float32)     # (nb, c, TL) target tile
    # TODO(synk): for c < 8 the (c, TL) vregs are sublane-underfilled; packing
    # spatial columns into the sublane axis (segmented reduce) or a bf16 exp
    # path would recover EUP throughput on v7x.

    # softmax(target) pieces along the channel axis, numerically stable.
    t_max = jnp.max(t, axis=1, keepdims=True)
    t_exp = jnp.exp(t - t_max)
    z_t = jnp.sum(t_exp, axis=1)                              # (nb, TL)

    # log_softmax(preds) via shifted logits.  Algebraic identity avoids
    # materializing -log_softmax as a full (nb, c, TL) tensor:
    #   sum_c softmax_t*(lse - p_shift) = lse - (1/z_t)*sum_c t_exp*p_shift
    p_max = jnp.max(p, axis=1, keepdims=True)
    p_shift = p - p_max
    lse = jnp.log(jnp.sum(jnp.exp(p_shift), axis=1))          # (nb, TL)
    cross = jnp.sum(t_exp * p_shift, axis=1)                  # (nb, TL)

    # One EUP reciprocal per spatial column (approx ~2^-11 rel err; errors of
    # random sign average out over columns -- fine at the test tolerance).
    row = lse - cross * pl.reciprocal(z_t, approx=True)       # (nb, TL)

    gt = pl.program_id(1) * s_inner + si   # global spatial tile index

    if needs_mask:  # static python branch
        # Only boundary/overhang tiles pay for iota+select.  The select must
        # stay BEFORE the accumulate: out-of-range lanes hold unspecified
        # (possibly non-finite) data read past the end of the spatial axis.
        in_bounds = gt < num_full_tiles

        @pl.when(in_bounds)
        def _():
            acc_ref[...] += row

        @pl.when(jnp.logical_not(in_bounds))
        def _():
            col = gt * lane_tile + lax.broadcasted_iota(
                jnp.int32, (1, lane_tile), 1)
            acc_ref[...] += jnp.where(col < num_cols, row, 0.0)
    else:
        acc_ref[...] += row

    @pl.when(si == pl.num_programs(2) - 1)
    def _():
        # Single cross-lane reduce per (batch block, spatial chunk).
        o_ref[...] = jnp.sum(acc_ref[...], axis=1).reshape(o_ref.shape)


def _vmem_capacity_bytes():
    """Physical per-core VMEM (128 MiB on v5e/v6e, 64 MiB on v7x)."""
    try:
        return int(pltpu.get_tpu_info().vmem_capacity_bytes)
    except Exception:
        return 64 * 1024 * 1024   # conservative fallback (v7x-sized)


@jax.jit
def criterion_kl(preds, target):
    """preds, target: (n, c, w, h). Returns scalar f32 loss."""
    assert preds.shape == target.shape
    n, c, w, h = preds.shape
    num_cols = w * h

    # Free reshapes of contiguous NCHW -- no transpose, no wrapper-side upcast.
    p3 = preds.reshape(n, c, num_cols)
    t3 = target.reshape(n, c, num_cols)

    itemsize = max(jnp.dtype(preds.dtype).itemsize,
                   jnp.dtype(target.dtype).itemsize)

    # Generation-aware budgets.
    if _vmem_capacity_bytes() >= 96 * 1024 * 1024:     # v5e / v6e: 128 MiB VMEM
        target_block_bytes = 8 * 1024 * 1024
        vmem_budget = 48 * 1024 * 1024
        vmem_limit = 64 * 1024 * 1024
    else:                                              # v7x (64 MiB) / unknown
        target_block_bytes = 4 * 1024 * 1024
        vmem_budget = 22 * 1024 * 1024
        vmem_limit = 32 * 1024 * 1024

    # Pack multiple batch elements per block when one image is far below the
    # block target.  nb is the largest divisor of n under the target so no
    # batch row is ever out of bounds.
    cols_padded = pl.cdiv(num_cols, 128) * 128
    per_batch_bytes = c * cols_padded * itemsize
    nb = int(max(1, min(n, target_block_bytes // per_batch_bytes)))
    while n % nb != 0:
        nb -= 1
    n_outer = n // nb

    # Lane tile: biggest multiple of 128 hitting the block target while
    # (2 inputs x 2 pipeline buffers + f32 accumulator) stays under budget.
    per_lane_bytes = nb * (4 * c * itemsize + 4)
    tl_vmem_cap = max(128, (vmem_budget // per_lane_bytes) // 128 * 128)
    tl_target = max(128, (target_block_bytes // (nb * c * itemsize)) // 128 * 128)
    lane_tile = int(min(tl_target, tl_vmem_cap, cols_padded))
    num_tiles = pl.cdiv(num_cols, lane_tile)

    # v7x has two TensorCores: if the batch axis alone gives a single parallel
    # chunk, split the spatial axis into two parallel chunks.
    s_outer = 2 if (n_outer < 2 and num_tiles >= 2) else 1
    s_inner = pl.cdiv(num_tiles, s_outer)

    num_full_tiles = num_cols // lane_tile
    needs_mask = (s_outer * s_inner) > num_full_tiles

    def in_map(b, so, si):
        # Clamp so overhang tiles (ragged spatial split) re-read the last
        # valid tile instead of DMA-ing past the array; the kernel masks them.
        return (b, 0, jnp.minimum(so * s_inner + si, num_tiles - 1))

    kernel = functools.partial(
        _kl_sum_kernel,
        num_cols=num_cols,
        lane_tile=lane_tile,
        s_inner=s_inner,
        num_full_tiles=num_full_tiles,
        needs_mask=needs_mask,
    )

    partials = pl.pallas_call(
        kernel,
        out_shape=jax.ShapeDtypeStruct((s_outer, n_outer, 1, nb), jnp.float32),
        grid_spec=pltpu.PrefetchScalarGridSpec(
            num_scalar_prefetch=0,
            grid=(n_outer, s_outer, s_inner),
            in_specs=[
                pl.BlockSpec((nb, c, lane_tile), in_map),
                pl.BlockSpec((nb, c, lane_tile), in_map),
            ],
            out_specs=pl.BlockSpec((1, 1, 1, nb),
                                   lambda b, so, si: (so, b, 0, 0)),
            scratch_shapes=[pltpu.VMEM((nb, lane_tile), jnp.float32)],
        ),
        compiler_params=pltpu.CompilerParams(
            dimension_semantics=("parallel", "parallel", "arbitrary"),
            vmem_limit_bytes=vmem_limit,
        ),
    )(p3, t3)

    return jnp.sum(partials) / jnp.float32(w) / jnp.float32(h)


def _reference_kl(preds, target):
    n, c, w, h = preds.shape
    p2 = jnp.transpose(preds, (0, 2, 3, 1)).reshape(-1, c).astype(jnp.float32)
    t2 = jnp.transpose(target, (0, 2, 3, 1)).reshape(-1, c).astype(jnp.float32)
    sm_t = jax.nn.softmax(t2, axis=1)
    lsm_p = jax.nn.log_softmax(p2, axis=1)
    return jnp.sum(-sm_t * lsm_p) / w / h


if __name__ == "__main__":
    key = jax.random.PRNGKey(0)
    k1, k2 = jax.random.split(key)
    n, c, w, h = 2, 4, 16, 16
    preds = jax.random.normal(k1, (n, c, w, h), dtype=jnp.float32)
    target = jax.random.normal(k2, (n, c, w, h), dtype=jnp.float32)

    loss = jax.block_until_ready(criterion_kl(preds, target))
    ref = jax.block_until_ready(_reference_kl(preds, target))

    # approx=True reciprocal (EUP) perturbs low bits vs exact division, so the
    # tolerance is slightly looser than 1e-5.
    assert jnp.allclose(loss, ref, rtol=2e-4, atol=1e-5), (loss, ref)

    print("KERNEL_OK")
</pallas_src>

<mosaic_0001>
module attributes {stable_mosaic.version = 11 : i64} {
  func.func @_kl_sum_kernel(%arg0: i32, %arg1: i32, %arg2: i32, %arg3: memref<2x4x256xf32, #tpu.memory_space<vmem>>, %arg4: memref<2x4x256xf32, #tpu.memory_space<vmem>>, %arg5: memref<1x1x1x2xf32, #tpu.memory_space<vmem>>, %arg6: memref<2x256xf32, #tpu.memory_space<vmem>>) attributes {dimension_semantics = [#tpu.dimension_semantics<parallel>, #tpu.dimension_semantics<parallel>, #tpu.dimension_semantics<arbitrary>], iteration_bounds = array<i64: 1, 1, 1>, scalar_prefetch = 0 : i64, scratch_operands = 1 : i64, tpu.core_type = #tpu.core_type<tc>, window_params = [{transform_indices = @transform_0, window_bounds = array<i64: 2, 4, 256>}, {transform_indices = @transform_1, window_bounds = array<i64: 2, 4, 256>}, {transform_indices = @transform_2, window_bounds = array<i64: 1, 1, 1, 2>}]} {
    %c0_i32 = arith.constant 0 : i32
    %0 = arith.cmpi eq, %arg2, %c0_i32 : i32
    %1 = arith.extui %0 : i1 to i32
    %c0_i32_0 = arith.constant 0 : i32
    %2 = arith.cmpi ne, %1, %c0_i32_0 : i32
    scf.if %2 {
      %cst_16 = arith.constant 0.000000e+00 : f32
      %29 = vector.broadcast %cst_16 : f32 to vector<2x256xf32>
      %c0_17 = arith.constant 0 : index
      %c0_18 = arith.constant 0 : index
      %30 = vector.load %arg6[%c0_17, %c0_18] : memref<2x256xf32, #tpu.memory_space<vmem>>, vector<2x256xf32>
      tpu.vector_store %arg6[%c0_17, %c0_18], %29 {strides = array<i32>} : memref<2x256xf32, #tpu.memory_space<vmem>>, vector<2x256xf32>,
    } else {
    }
    %c0 = arith.constant 0 : index
    %c0_1 = arith.constant 0 : index
    %c0_2 = arith.constant 0 : index
    %3 = vector.load %arg3[%c0, %c0_1, %c0_2] : memref<2x4x256xf32, #tpu.memory_space<vmem>>, vector<2x4x256xf32>
    %c0_3 = arith.constant 0 : index
    %c0_4 = arith.constant 0 : index
    %c0_5 = arith.constant 0 : index
    %4 = vector.load %arg4[%c0_3, %c0_4, %c0_5] : memref<2x4x256xf32, #tpu.memory_space<vmem>>, vector<2x4x256xf32>
    %cst = arith.constant dense<0xFF800000> : vector<2x256xf32>
    %5 = vector.multi_reduction <maximumf>, %4, %cst [1] : vector<2x4x256xf32> to vector<2x256xf32>
    %6 = vector.shape_cast %5 : vector<2x256xf32> to vector<2x1x256xf32>
    %7 = vector.broadcast %6 : vector<2x1x256xf32> to vector<2x4x256xf32>
    %8 = arith.subf %4, %7 : vector<2x4x256xf32>
    %9 = math.exp %8 : vector<2x4x256xf32>
    %cst_6 = arith.constant dense<0.000000e+00> : vector<2x256xf32>
    %10 = vector.multi_reduction <add>, %9, %cst_6 [1] : vector<2x4x256xf32> to vector<2x256xf32>
    %cst_7 = arith.constant dense<0xFF800000> : vector<2x256xf32>
    %11 = vector.multi_reduction <maximumf>, %3, %cst_7 [1] : vector<2x4x256xf32> to vector<2x256xf32>
    %12 = vector.shape_cast %11 : vector<2x256xf32> to vector<2x1x256xf32>
    %13 = vector.broadcast %12 : vector<2x1x256xf32> to vector<2x4x256xf32>
    %14 = arith.subf %3, %13 : vector<2x4x256xf32>
    %15 = math.exp %14 : vector<2x4x256xf32>
    %cst_8 = arith.constant dense<0.000000e+00> : vector<2x256xf32>
    %16 = vector.multi_reduction <add>, %15, %cst_8 [1] : vector<2x4x256xf32> to vector<2x256xf32>
    %17 = math.log %16 : vector<2x256xf32>
    %18 = arith.mulf %9, %14 : vector<2x4x256xf32>
    %cst_9 = arith.constant dense<0.000000e+00> : vector<2x256xf32>
    %19 = vector.multi_reduction <add>, %18, %cst_9 [1] : vector<2x4x256xf32> to vector<2x256xf32>
    %20 = tpu.reciprocal %10 {approx = true} : vector<2x256xf32> -> vector<2x256xf32>
    %21 = arith.mulf %19, %20 : vector<2x256xf32>
    %22 = arith.subf %17, %21 : vector<2x256xf32>
    %c0_10 = arith.constant 0 : index
    %c0_11 = arith.constant 0 : index
    %23 = vector.load %arg6[%c0_10, %c0_11] : memref<2x256xf32, #tpu.memory_space<vmem>>, vector<2x256xf32>
    %24 = arith.addf %23, %22 : vector<2x256xf32>
    %c0_12 = arith.constant 0 : index
    %c0_13 = arith.constant 0 : index
    %25 = vector.load %arg6[%c0_12, %c0_13] : memref<2x256xf32, #tpu.memory_space<vmem>>, vector<2x256xf32>
    tpu.vector_store %arg6[%c0_12, %c0_13], %24 {strides = array<i32>} : memref<2x256xf32, #tpu.memory_space<vmem>>, vector<2x256xf32>,
    %c0_i32_14 = arith.constant 0 : i32
    %26 = arith.cmpi eq, %arg2, %c0_i32_14 : i32
    %27 = arith.extui %26 : i1 to i32
    %c0_i32_15 = arith.constant 0 : i32
    %28 = arith.cmpi ne, %27, %c0_i32_15 : i32
    scf.if %28 {
      %c0_16 = arith.constant 0 : index
      %c0_17 = arith.constant 0 : index
      %29 = vector.load %arg6[%c0_16, %c0_17] : memref<2x256xf32, #tpu.memory_space<vmem>>, vector<2x256xf32>
      %cst_18 = arith.constant dense<0.000000e+00> : vector<2xf32>
      %30 = vector.multi_reduction <add>, %29, %cst_18 [1] : vector<2x256xf32> to vector<2xf32>
      %31 = vector.shape_cast %30 : vector<2xf32> to vector<1x1x1x2xf32>
      %c0_19 = arith.constant 0 : index
      %c0_20 = arith.constant 0 : index
      %c0_21 = arith.constant 0 : index
      %c0_22 = arith.constant 0 : index
      %32 = vector.load %arg5[%c0_19, %c0_20, %c0_21, %c0_22] : memref<1x1x1x2xf32, #tpu.memory_space<vmem>>, vector<1x1x1x2xf32>
      tpu.vector_store %arg5[%c0_19, %c0_20, %c0_21, %c0_22], %31 {strides = array<i32>} : memref<1x1x1x2xf32, #tpu.memory_space<vmem>>, vector<1x1x1x2xf32>,
    } else {
    }
    return
  }
  func.func @transform_0(%arg0: i32, %arg1: i32, %arg2: i32) -> (i32, i32, i32) {
    %c1_i32 = arith.constant 1 : i32
    %0 = arith.muli %arg1, %c1_i32 : i32
    %1 = arith.addi %0, %arg2 : i32
    %c0_i32 = arith.constant 0 : i32
    %2 = arith.minsi %1, %c0_i32 : i32
    %c0_i32_0 = arith.constant 0 : i32
    %c0_i32_1 = arith.constant 0 : i32
    return %arg0, %c0_i32_0, %2 : i32, i32, i32
  }
  func.func @transform_1(%arg0: i32, %arg1: i32, %arg2: i32) -> (i32, i32, i32) {
    %c1_i32 = arith.constant 1 : i32
    %0 = arith.muli %arg1, %c1_i32 : i32
    %1 = arith.addi %0, %arg2 : i32
    %c0_i32 = arith.constant 0 : i32
    %2 = arith.minsi %1, %c0_i32 : i32
    %c0_i32_0 = arith.constant 0 : i32
    %c0_i32_1 = arith.constant 0 : i32
    return %arg0, %c0_i32_0, %2 : i32, i32, i32
  }
  func.func @transform_2(%arg0: i32, %arg1: i32, %arg2: i32) -> (i32, i32, i32, i32) {
    %c0_i32 = arith.constant 0 : i32
    %c0_i32_0 = arith.constant 0 : i32
    %c0_i32_1 = arith.constant 0 : i32
    return %arg1, %arg0, %c0_i32, %c0_i32_0 : i32, i32, i32, i32
  }
}

</mosaic_0001>

<bundles_post_ra>
// kernel: criterion_kl.1
= control target key start
LH: loop header
LB: loop body
LE: loop exit
PB: predicated region body
PF: predicated region fallthrough
CT: control target
= control target key end

     0   :  { %v433_v0 = vmov 0.0   ;;  %vm97_vm0 = vcmask 1043456   ;;  %vm351_vm1 = vcmask 1041408   ;;  %vm359_vm2 = vcmask 1041409   ;;  %s500_s1 = inlined_call_operand.vmem [shape: f32[2,4,256], index: 1, kind: input, shape index: {}]   ;;  %s501_s0 = inlined_call_operand.vmem [shape: f32[2,4,256], index: 0, kind: input, shape index: {}]   ;;  %s502_s2 = inlined_call_operand.vmem [shape: f32[1,1,1,2], index: 2, kind: output, shape index: {}]  }
   0x1   :  { %79 = vst [vmem:[#allocation2] sm:$0xf] %v433_v0  ;;  %v82_v1 = vld [vmem:[%s500_s1] sm:$0xff]  ;;  %v83_v2 = vld [vmem:[%s500_s1 + $0x8] sm:$0xff]  ;;  %vm361_vm3 = vcmask 1043459   ;;  %vm363_vm4 = vcmask 1045509  }
   0x2   :  { %86 = vst [vmem:[#allocation1] ss:$2 sm:$0xff] %v82_v1  ;;  %v80_v45 = vld [vmem:[%s501_s0] sm:$0xff]  ;;  %v81_v46 = vld [vmem:[%s501_s0 + $0x8] sm:$0xff]  ;;  %vm365_vm5 = vcmask 1047559   ;;  %vm390_vm6 = vcmask 8192  }
   0x3   :  { %90 = vst [vmem:[#allocation1 + $0x10] ss:$2 sm:$0xff] %v83_v2 }
   0x9   :  { %v87_v3 = vld.sshfl [vmem:[#allocation1] sm:$0xff pattern:$0x75316420]  ;;  %v88_v4 = vld.sshfl [vmem:[#allocation1 + $0x8] sm:$0xff pattern:$0x75316420] }
   0xa   :  { %v91_v5 = vld.sshfl [vmem:[#allocation1 + $0x10] sm:$0xff pattern:$0x75316420]  ;;  %v92_v6 = vld.sshfl [vmem:[#allocation1 + $0x18] sm:$0xff pattern:$0x75316420] }
   0xb   :  { %v98_v7 = vsel %vm97_vm0, %v87_v3, -inf  ;;  %v105_v8 = vsel %vm97_vm0, %v88_v4, -inf  ;;  %v112_v9 = vsel %vm97_vm0, %v91_v5, -inf  ;;  %v119_v10 = vsel %vm97_vm0, %v92_v6, -inf }
   0xc   :  { %v99_v11 = vrot.slane %v98_v7, 4  ;;  %v106_v12 = vrot.slane %v105_v8, 4  ;;  %v113_v13 = vrot.slane %v112_v9, 4  ;;  %v120_v14 = vrot.slane %v119_v10, 4 }
   0xe   :  { %v100_v15 = vmax.f32 %v98_v7, %v99_v11  ;;  %v107_v16 = vmax.f32 %v105_v8, %v106_v12  ;;  %v114_v17 = vmax.f32 %v112_v9, %v113_v13  ;;  %v121_v18 = vmax.f32 %v119_v10, %v120_v14 }
  0x10   :  { %v101_v19 = vrot.slane %v100_v15, 2  ;;  %v108_v20 = vrot.slane %v107_v16, 2  ;;  %v115_v21 = vrot.slane %v114_v17, 2  ;;  %v122_v22 = vrot.slane %v121_v18, 2 }
  0x12   :  { %v102_v23 = vmax.f32 %v100_v15, %v101_v19  ;;  %v109_v24 = vmax.f32 %v107_v16, %v108_v20  ;;  %v116_v25 = vmax.f32 %v114_v17, %v115_v21  ;;  %v123_v26 = vmax.f32 %v121_v18, %v122_v22 }
  0x14   :  { %v103_v27 = vrot.slane %v102_v23, 1  ;;  %v110_v28 = vrot.slane %v109_v24, 1  ;;  %v117_v29 = vrot.slane %v116_v25, 1  ;;  %v124_v30 = vrot.slane %v123_v26, 1 }
  0x16   :  { %v104_v31 = vmax.f32 %v102_v23, %v103_v27  ;;  %v111_v32 = vmax.f32 %v109_v24, %v110_v28  ;;  %v118_v33 = vmax.f32 %v116_v25, %v117_v29  ;;  %v125_v34 = vmax.f32 %v123_v26, %v124_v30 }
  0x18   :  { %v130_v35 = vrot.slane %v111_v32, 4  ;;  %v131_v36 = vrot.slane %v125_v34, 4 }
  0x1a   :  { %v132_v37 = vsel %vm97_vm0, %v104_v31, %v130_v35  ;;  %v133_v38 = vsel %vm97_vm0, %v118_v33, %v131_v36 }
  0x1b   :  { %v136_v39 = vsub.f32 %v82_v1, %v132_v37  ;;  %v137_v40 = vsub.f32 %v83_v2, %v133_v38 }
  0x1d   :  { %v138_v41 = vmul.f32 1.442695, %v136_v39  ;;  %v140_v42 = vmul.f32 1.442695, %v137_v40 }
  0x1f   :  { %409 = vpow2.f32 %v138_v41 }
  0x20   :  { %411 = vpow2.f32 %v140_v42 }
  0x25   :  { %v461_v43 = vpop.eup %409 }
  0x26   :  { %v463_v44 = vpop.eup %411  ;;  %144 = vst [vmem:[#allocation1] ss:$2 sm:$0xff] %v461_v43 }
  0x27   :  { %148 = vst [vmem:[#allocation1 + $0x10] ss:$2 sm:$0xff] %v463_v44 }
  0x2d   :  { %v145_v47 = vld.sshfl [vmem:[#allocation1] sm:$0xff pattern:$0x75316420]  ;;  %v146_v48 = vld.sshfl [vmem:[#allocation1 + $0x8] sm:$0xff pattern:$0x75316420] }
  0x2e   :  { %v149_v49 = vld.sshfl [vmem:[#allocation1 + $0x10] sm:$0xff pattern:$0x75316420]  ;;  %v150_v50 = vld.sshfl [vmem:[#allocation1 + $0x18] sm:$0xff pattern:$0x75316420] }
  0x2f   :  { %185 = vst [vmem:[#allocation1] ss:$2 sm:$0xff] %v80_v45  ;;  %v176_v15 = vsel %vm97_vm0, %v150_v50, 0.0  ;;  %v162_v20 = vsel %vm97_vm0, %v146_v48, 0.0  ;;  %v155_v23 = vsel %vm97_vm0, %v145_v47, 0.0  ;;  %v169_v24 = vsel %vm97_vm0, %v149_v49, 0.0 }
  0x30   :  { %189 = vst [vmem:[#allocation1 + $0x10] ss:$2 sm:$0xff] %v81_v46  ;;  %v177_v25 = vrot.slane %v176_v15, 4  ;;  %v163_v26 = vrot.slane %v162_v20, 4  ;;  %v156_v31 = vrot.slane %v155_v23, 4  ;;  %v170_v32 = vrot.slane %v169_v24, 4 }
  0x32   :  { %v178_v33 = vadd.f32 %v177_v25, %v176_v15  ;;  %v164_v36 = vadd.f32 %v163_v26, %v162_v20  ;;  %v157_v37 = vadd.f32 %v156_v31, %v155_v23  ;;  %v171_v38 = vadd.f32 %v170_v32, %v169_v24 }
  0x34   :  { %v179_v39 = vrot.slane %v178_v33, 2  ;;  %v165_v40 = vrot.slane %v164_v36, 2  ;;  %v158_v41 = vrot.slane %v157_v37, 2  ;;  %v172_v42 = vrot.slane %v171_v38, 2 }
  0x36   :  { %v186_v51 = vld.sshfl [vmem:[#allocation1] sm:$0xff pattern:$0x75316420]  ;;  %v187_v52 = vld.sshfl [vmem:[#allocation1 + $0x8] sm:$0xff pattern:$0x75316420]  ;;  %v180_v48 = vadd.f32 %v179_v39, %v178_v33  ;;  %v166_v50 = vadd.f32 %v165_v40, %v164_v36 }
  0x37   :  { %v190_v53 = vld.sshfl [vmem:[#allocation1 + $0x10] sm:$0xff pattern:$0x75316420]  ;;  %v191_v54 = vld.sshfl [vmem:[#allocation1 + $0x18] sm:$0xff pattern:$0x75316420] }
  0x38   :  { %v196_v55 = vsel %vm97_vm0, %v186_v51, -inf  ;;  %v203_v56 = vsel %vm97_vm0, %v187_v52, -inf  ;;  %v210_v57 = vsel %vm97_vm0, %v190_v53, -inf  ;;  %v217_v58 = vsel %vm97_vm0, %v191_v54, -inf }
  0x39   :  { %v197_v59 = vrot.slane %v196_v55, 4  ;;  %v204_v60 = vrot.slane %v203_v56, 4  ;;  %v211_v61 = vrot.slane %v210_v57, 4  ;;  %v218_v62 = vrot.slane %v217_v58, 4 }
  0x3a   :  { %v181_v51 = vrot.slane %v180_v48, 1  ;;  %v167_v52 = vrot.slane %v166_v50, 1 }
  0x3b   :  { %v198_v63 = vmax.f32 %v196_v55, %v197_v59  ;;  %v205_v0 = vmax.f32 %v203_v56, %v204_v60  ;;  %v212_v1 = vmax.f32 %v210_v57, %v211_v61  ;;  %v219_v2 = vmax.f32 %v217_v58, %v218_v62 }
  0x3c   :  { %v182_v57 = vadd.f32 %v181_v51, %v180_v48  ;;  %v168_v60 = vadd.f32 %v167_v52, %v166_v50 }
  0x3d   :  { %v199_v3 = vrot.slane %v198_v63, 2  ;;  %v206_v4 = vrot.slane %v205_v0, 2  ;;  %v213_v5 = vrot.slane %v212_v1, 2  ;;  %v220_v6 = vrot.slane %v219_v2, 2 }
  0x3f   :  { %v200_v7 = vmax.f32 %v198_v63, %v199_v3  ;;  %v207_v8 = vmax.f32 %v205_v0, %v206_v4  ;;  %v214_v9 = vmax.f32 %v212_v1, %v213_v5  ;;  %v221_v10 = vmax.f32 %v219_v2, %v220_v6 }
  0x41   :  { %v201_v11 = vrot.slane %v200_v7, 1  ;;  %v208_v12 = vrot.slane %v207_v8, 1  ;;  %v215_v13 = vrot.slane %v214_v9, 1  ;;  %v222_v14 = vrot.slane %v221_v10, 1 }
  0x43   :  { %v202_v16 = vmax.f32 %v200_v7, %v201_v11  ;;  %v209_v17 = vmax.f32 %v207_v8, %v208_v12  ;;  %v216_v18 = vmax.f32 %v214_v9, %v215_v13  ;;  %v223_v19 = vmax.f32 %v221_v10, %v222_v14 }
  0x45   :  { %v228_v21 = vrot.slane %v209_v17, 4  ;;  %v229_v22 = vrot.slane %v223_v19, 4 }
  0x47   :  { %v230_v27 = vsel %vm97_vm0, %v202_v16, %v228_v21  ;;  %v231_v28 = vsel %vm97_vm0, %v216_v18, %v229_v22 }
  0x48   :  { %v234_v29 = vsub.f32 %v80_v45, %v230_v27  ;;  %v235_v30 = vsub.f32 %v81_v46, %v231_v28  ;;  %v159_v45 = vadd.f32 %v158_v41, %v157_v37  ;;  %v173_v46 = vadd.f32 %v172_v42, %v171_v38 }
  0x4a   :  { %v236_v34 = vmul.f32 1.442695, %v234_v29  ;;  %v238_v35 = vmul.f32 1.442695, %v235_v30  ;;  %v289_v53 = vmul.f32 %v461_v43, %v234_v29  ;;  %v160_v54 = vrot.slane %v159_v45, 1 }
  0x4b   :  { %v174_v55 = vrot.slane %v173_v46, 1  ;;  %v290_v56 = vmul.f32 %v463_v44, %v235_v30 }
  0x4c   :  { %413 = vpow2.f32 %v236_v34  ;;  %v161_v10 = vadd.f32 %v160_v54, %v159_v45 }
  0x4d   :  { %415 = vpow2.f32 %v238_v35  ;;  %v175_v44 = vadd.f32 %v174_v55, %v173_v46 }
  0x4e   :  { %417 = vrcp.f32 %v182_v57 }
  0x4f   :  { %419 = vrcp.f32 %v168_v60 }
  0x50   :  { %421 = vrcp.f32 %v175_v44 }
  0x51   :  { %423 = vrcp.f32 %v161_v10 }
  0x52   :  { %v414_v47 = vpop.eup %413 }
  0x53   :  { %v416_v49 = vpop.eup %415  ;;  %242 = vst [vmem:[#allocation1] ss:$2 sm:$0xff] %v414_v47 }
  0x54   :  { %246 = vst [vmem:[#allocation1 + $0x10] ss:$2 sm:$0xff] %v416_v49  ;;  %v418_v21 = vpop.eup %417 }
  0x55   :  { %v420_v28 = vpop.eup %419 }
  0x56   :  { %v422_v37 = vpop.eup %421 }
  0x57   :  { %v424_v42 = vpop.eup %423 }
  0x5a   :  { %v243_v58 = vld.sshfl [vmem:[#allocation1] sm:$0xff pattern:$0x75316420]  ;;  %v244_v59 = vld.sshfl [vmem:[#allocation1 + $0x8] sm:$0xff pattern:$0x75316420] }
  0x5b   :  { %v247_v61 = vld.sshfl [vmem:[#allocation1 + $0x10] sm:$0xff pattern:$0x75316420]  ;;  %v248_v62 = vld.sshfl [vmem:[#allocation1 + $0x18] sm:$0xff pattern:$0x75316420] }
  0x5c   :  { %v253_v63 = vsel %vm97_vm0, %v243_v58, 0.0  ;;  %v260_v0 = vsel %vm97_vm0, %v244_v59, 0.0  ;;  %v267_v1 = vsel %vm97_vm0, %v247_v61, 0.0  ;;  %v274_v2 = vsel %vm97_vm0, %v248_v62, 0.0  ;;  %293 = vst [vmem:[#allocation1] ss:$2 sm:$0xff] %v289_v53 }
  0x5d   :  { %v254_v43 = vrot.slane %v253_v63, 4  ;;  %v261_v3 = vrot.slane %v260_v0, 4  ;;  %v268_v4 = vrot.slane %v267_v1, 4  ;;  %v275_v5 = vrot.slane %v274_v2, 4  ;;  %297 = vst [vmem:[#allocation1 + $0x10] ss:$2 sm:$0xff] %v290_v56 }
  0x5f   :  { %v255_v6 = vadd.f32 %v254_v43, %v253_v63  ;;  %v262_v7 = vadd.f32 %v261_v3, %v260_v0  ;;  %v269_v8 = vadd.f32 %v268_v4, %v267_v1  ;;  %v276_v9 = vadd.f32 %v275_v5, %v274_v2 }
  0x61   :  { %v256_v11 = vrot.slane %v255_v6, 2  ;;  %v263_v12 = vrot.slane %v262_v7, 2  ;;  %v270_v13 = vrot.slane %v269_v8, 2  ;;  %v277_v14 = vrot.slane %v276_v9, 2 }
  0x63   :  { %v257_v15 = vadd.f32 %v256_v11, %v255_v6  ;;  %v264_v16 = vadd.f32 %v263_v12, %v262_v7  ;;  %v271_v17 = vadd.f32 %v270_v13, %v269_v8  ;;  %v278_v18 = vadd.f32 %v277_v14, %v276_v9  ;;  %v294_v19 = vld.sshfl [vmem:[#allocation1] sm:$0xff pattern:$0x75316420]  ;;  %v295_v20 = vld.sshfl [vmem:[#allocation1 + $0x8] sm:$0xff pattern:$0x75316420] }
  0x64   :  { %v298_v22 = vld.sshfl [vmem:[#allocation1 + $0x10] sm:$0xff pattern:$0x75316420]  ;;  %v299_v23 = vld.sshfl [vmem:[#allocation1 + $0x18] sm:$0xff pattern:$0x75316420] }
  0x65   :  { %v258_v24 = vrot.slane %v257_v15, 1  ;;  %v265_v25 = vrot.slane %v264_v16, 1  ;;  %v272_v26 = vrot.slane %v271_v17, 1  ;;  %v279_v27 = vrot.slane %v278_v18, 1 }
  0x66   :  { %v304_v29 = vsel %vm97_vm0, %v294_v19, 0.0  ;;  %v311_v30 = vsel %vm97_vm0, %v295_v20, 0.0  ;;  %v318_v31 = vsel %vm97_vm0, %v298_v22, 0.0  ;;  %v325_v32 = vsel %vm97_vm0, %v299_v23, 0.0  ;;  %v344_v22 = vld [vmem:[#allocation2] sm:$0xf] }
  0x67   :  { %v259_v33 = vadd.f32 %v258_v24, %v257_v15  ;;  %v266_v34 = vadd.f32 %v265_v25, %v264_v16  ;;  %v273_v35 = vadd.f32 %v272_v26, %v271_v17  ;;  %v280_v36 = vadd.f32 %v279_v27, %v278_v18 }
  0x68   :  { %v305_v38 = vrot.slane %v304_v29, 4  ;;  %v312_v39 = vrot.slane %v311_v30, 4  ;;  %v319_v40 = vrot.slane %v318_v31, 4  ;;  %v326_v41 = vrot.slane %v325_v32, 4 }
  0x69   :  { %425 = vlog2.f32 %v259_v33 }
  0x6a   :  { %427 = vlog2.f32 %v266_v34  ;;  %v306_v47 = vadd.f32 %v305_v38, %v304_v29  ;;  %v313_v48 = vadd.f32 %v312_v39, %v311_v30  ;;  %v320_v49 = vadd.f32 %v319_v40, %v318_v31 }
  0x6b   :  { %429 = vlog2.f32 %v273_v35  ;;  %v327_v50 = vadd.f32 %v326_v41, %v325_v32  ;;  %v386_v32 = vlaneseq }
  0x6c   :  { %431 = vlog2.f32 %v280_v36  ;;  %v307_v45 = vrot.slane %v306_v47, 2  ;;  %v314_v46 = vrot.slane %v313_v48, 2  ;;  %v321_v51 = vrot.slane %v320_v49, 2 }
  0x6d   :  { %v328_v52 = vrot.slane %v327_v50, 2  ;;  %v387_v33 = vand.u32 127, %v386_v32 }
  0x6e   :  { %v308_v53 = vadd.f32 %v307_v45, %v306_v47  ;;  %v315_v54 = vadd.f32 %v314_v46, %v313_v48  ;;  %v322_v55 = vadd.f32 %v321_v51, %v320_v49 }
  0x6f   :  { %v426_v56 = vpop.eup %425  ;;  %v329_v57 = vadd.f32 %v328_v52, %v327_v50 }
  0x70   :  { %v428_v58 = vpop.eup %427  ;;  %v309_v59 = vrot.slane %v308_v53, 1  ;;  %v316_v60 = vrot.slane %v315_v54, 1  ;;  %v323_v61 = vrot.slane %v322_v55, 1  ;;  %v282_v4 = vmul.f32 0.6931472, %v426_v56 }
  0x71   :  { %v430_v62 = vpop.eup %429  ;;  %v330_v63 = vrot.slane %v329_v57, 1  ;;  %v284_v1 = vmul.f32 0.6931472, %v428_v58 }
  0x72   :  { %v432_v0 = vpop.eup %431  ;;  %v310_v2 = vadd.f32 %v309_v59, %v308_v53  ;;  %v317_v43 = vadd.f32 %v316_v60, %v315_v54  ;;  %v324_v3 = vadd.f32 %v323_v61, %v322_v55  ;;  %v286_v5 = vmul.f32 0.6931472, %v430_v62 }
  0x73   :  { %v288_v44 = vmul.f32 0.6931472, %v432_v0  ;;  %v331_v6 = vadd.f32 %v330_v63, %v329_v57 }
  0x74   :  { %v336_v7 = vmul.f32 %v424_v42, %v310_v2  ;;  %v337_v8 = vmul.f32 %v420_v28, %v317_v43  ;;  %v338_v9 = vmul.f32 %v422_v37, %v324_v3 }
  0x75   :  { %v339_v10 = vmul.f32 %v418_v21, %v331_v6 }
  0x76   :  { %v341_v11 = vsub.f32 %v284_v1, %v337_v8  ;;  %v340_v12 = vsub.f32 %v282_v4, %v336_v7  ;;  %v342_v13 = vsub.f32 %v286_v5, %v338_v9 }
  0x77   :  { %v343_v14 = vsub.f32 %v288_v44, %v339_v10 }
  0x78   :  { %v349_v15 = vrot.slane %v341_v11, 6 }
  0x79   :  { %v350_v16 = vrot.slane %v343_v14, 6 }
  0x7a   :  { %v352_v17 = vsel %vm351_vm1, %v340_v12, %v349_v15 }
  0x7b   :  { %v353_v18 = vsel %vm351_vm1, %v342_v13, %v350_v16 }
  0x7c   :  { %v358_v19 = vrot.slane %v353_v18, 7 }
  0x7e   :  { %v360_v20 = vsel %vm359_vm2, %v358_v19, %v352_v17 }
  0x7f   :  { %v362_v23 = vsel %vm361_vm3, %v358_v19, %v360_v20 }
  0x80   :  { %v364_v21 = vsel %vm363_vm4, %v358_v19, %v362_v23 }
  0x81   :  { %v366_v24 = vsel %vm365_vm5, %v358_v19, %v364_v21 }
  0x82   :  { %v368_v25 = vadd.f32 %v366_v24, %v344_v22 }
  0x84   :  { %369 = vst [vmem:[#allocation2] sm:$0xf] %v368_v25 }
  0x8b   :  { %v373_v26 = vld [vmem:[#allocation2] sm:$0xf] }
  0x8c   :  { %375 = vst [vmem:[#allocation1] ss:$4 sm:$0xff] %v373_v26 }
  0x93   :  { %v376_v27 = vld.sshfl [vmem:[#allocation1] sm:$0xff pattern:$0x73625140]  ;;  %v377_v28 = vld.sshfl [vmem:[#allocation1 + $0x8] sm:$0xff pattern:$0x73625140] }
  0x94   :  { %v380_v29 = vsel %vm351_vm1, %v376_v27, 0.0  ;;  %v381_v30 = vsel %vm351_vm1, %v377_v28, 0.0 }
  0x95   :  { %v382_v31 = vadd.f32 %v381_v30, %v380_v29 }
  0x97   :  { %383 = vadd.xlane.f32.xlu0 %v382_v31 }
 0x10a   :  { %v384_v34 = vpop.xlane.xlu0 %383 }
 0x10b   :  { %v388_v35 = vperm.slane %v384_v34, %v387_v33 }
 0x10d   :  { %391 = vst.msk [vmem:[%s502_s2] sm:$0x1] %vm390_vm6, %v388_v35 }

</bundles_post_ra>
